<compile_context>
chip_gen: v5e
topology: v5e:2x2
jax: 0.10.0
libtpu: 0.0.40
codegen_flags: <defaults>
</compile_context>

<pallas_src>
import jax
import jax.numpy as jnp
import numpy as np
from jax.experimental import pallas as pl
from jax.experimental.pallas import tpu as pltpu

# PyTorch SELU constants
_SELU_ALPHA = 1.6732632423543772848170429916717
_SELU_SCALE = 1.0507009873554804934193349852946


def _selu_core(x):
    # Unscaled SELU core; the 1.0507 scale is folded into the NEXT layer's
    # weights at pack time (exact rescale of the affine layer).
    return jnp.where(x > 0, x, _SELU_ALPHA * (jnp.exp(x) - 1.0))


def _round_up(a, m):
    return ((a + m - 1) // m) * m


# ---------------------------------------------------------------------------
# Kernels: one batch tile of the fused (net_z || net_s) 4-layer MLP.
# Weights w1b/w1x/w2/w3/w4 are bf16; biases, w1t and all accumulation are f32.
# ---------------------------------------------------------------------------
def _fused_kernel_be(be_ref, x_ref, t_ref,
                     w1b_ref, w1x_ref, w1t_ref, b1_ref,
                     w2_ref, b2_ref, w3_ref, b3_ref,
                     w4_ref, b4_ref, o_ref):
    """flag_enable_batchtoken_flowmodule == True.

    be_ref: [TB, dim_b]  x_ref: [TB, dim_z+dim_s]  t_ref: [TB, 1]
    First layer is a split matmul (no wrapper-side concat):
        h1 = BatchEmb @ W1_b + x @ W1_x + t * W1_t + b1
    """
    bf16 = jnp.bfloat16
    h = jnp.dot(x_ref[...].astype(bf16), w1x_ref[...],
                preferred_element_type=jnp.float32)
    h = h + jnp.dot(be_ref[...].astype(bf16), w1b_ref[...],
                    preferred_element_type=jnp.float32)
    h = h + t_ref[...] * w1t_ref[...]          # [TB,1] * [1,2w] rank-1 update
    h = _selu_core(h + b1_ref[...])
    h = _selu_core(jnp.dot(h.astype(bf16), w2_ref[...],
                           preferred_element_type=jnp.float32) + b2_ref[...])
    h = _selu_core(jnp.dot(h.astype(bf16), w3_ref[...],
                           preferred_element_type=jnp.float32) + b3_ref[...])
    out = jnp.dot(h.astype(bf16), w4_ref[...],
                  preferred_element_type=jnp.float32) + b4_ref[...]
    o_ref[...] = out.astype(o_ref.dtype)


def _fused_kernel_nobe(x_ref, t_ref,
                       w1x_ref, w1t_ref, b1_ref,
                       w2_ref, b2_ref, w3_ref, b3_ref,
                       w4_ref, b4_ref, o_ref):
    """flag_enable_batchtoken_flowmodule == False."""
    bf16 = jnp.bfloat16
    h = jnp.dot(x_ref[...].astype(bf16), w1x_ref[...],
                preferred_element_type=jnp.float32)
    h = h + t_ref[...] * w1t_ref[...]
    h = _selu_core(h + b1_ref[...])
    h = _selu_core(jnp.dot(h.astype(bf16), w2_ref[...],
                           preferred_element_type=jnp.float32) + b2_ref[...])
    h = _selu_core(jnp.dot(h.astype(bf16), w3_ref[...],
                           preferred_element_type=jnp.float32) + b3_ref[...])
    out = jnp.dot(h.astype(bf16), w4_ref[...],
                  preferred_element_type=jnp.float32) + b4_ref[...]
    o_ref[...] = out.astype(o_ref.dtype)


# ---------------------------------------------------------------------------
# Wrapper: batch-tiled grid, VMEM-resident weights, ragged last block.
# ---------------------------------------------------------------------------
def _run_fused(t, x, be, packed, use_be, batch_tile):
    B, dzs = x.shape
    f32 = jnp.float32

    # Tile size: multiple of 8 sublanes; cap at ceil(B/2) rounded to 8 so that
    # batches >= 16 always produce >= 2 grid steps (both v7x TensorCores busy).
    batch_tile = _round_up(max(int(batch_tile), 8), 8)
    half = _round_up(-(-B // 2), 8)
    TB = max(8, min(batch_tile, half))
    n_steps = pl.cdiv(B, TB)

    x = x.astype(f32)
    t_col = t.astype(f32)[:, None]

    if use_be:
        be = be.astype(f32)
        W1b, W1x, W1t, B1, W2, B2, W3, B3, W4, B4 = packed
        tile_args = (be, x, t_col)
        weight_args = (W1b, W1x, W1t, B1, W2, B2, W3, B3, W4, B4)
        kernel = _fused_kernel_be
    else:
        W1x, W1t, B1, W2, B2, W3, B3, W4, B4 = packed
        tile_args = (x, t_col)
        weight_args = (W1x, W1t, B1, W2, B2, W3, B3, W4, B4)
        kernel = _fused_kernel_nobe

    def tile_spec(a):
        # batch-tiled activation: block index advances with the grid step
        return pl.BlockSpec((TB, a.shape[1]), lambda i: (i, 0))

    def weight_spec(a):
        # full-array block, constant index -> stays VMEM-resident across steps
        return pl.BlockSpec(a.shape, lambda i: (0, 0))

    in_specs = ([tile_spec(a) for a in tile_args]
                + [weight_spec(a) for a in weight_args])

    two_w = W2.shape[0]
    din = sum(int(a.shape[1]) for a in tile_args)
    flops = int(2 * B * (din * two_w + 2 * two_w * two_w + two_w * dzs))
    transcendentals = int(3 * B * two_w)
    w_bytes = sum(int(np.prod(a.shape)) * int(a.dtype.itemsize)
                  for a in weight_args)
    bytes_accessed = int(4 * B * (din + dzs) + w_bytes)

    out = pl.pallas_call(
        kernel,
        out_shape=jax.ShapeDtypeStruct((B, dzs), f32),
        grid=(int(n_steps),),
        in_specs=in_specs,
        out_specs=pl.BlockSpec((TB, dzs), lambda i: (i, 0)),
        compiler_params=pltpu.CompilerParams(
            dimension_semantics=("parallel",),    # v7x: shard batch over 2 TCs
            vmem_limit_bytes=32 * 1024 * 1024),
        cost_estimate=pl.CostEstimate(
            flops=flops, transcendentals=transcendentals,
            bytes_accessed=bytes_accessed),
    )(*tile_args, *weight_args)

    return out


# ---------------------------------------------------------------------------
# Module
# ---------------------------------------------------------------------------
class MLPPallas:
    """JAX/Pallas port of mintflow.modules.neuralODE.MLP."""

    def __init__(self, dim_b, dim_z, dim_s, flag_enable_batchtoken_flowmodule,
                 w=64, key=None, batch_tile=2048):
        assert dim_z == dim_s
        self.dim_b = dim_b
        self.dim_z = dim_z
        self.dim_s = dim_s
        self.flag = flag_enable_batchtoken_flowmodule
        self.w = w
        self.batch_tile = batch_tile

        if key is None:
            key = jax.random.PRNGKey(0)

        din_z = (dim_b + dim_z + 1) if self.flag else (dim_z + 1)
        din_s = (dim_b + dim_z + dim_s + 1) if self.flag else (dim_z + dim_s + 1)

        def init_linear(k, fan_in, fan_out):
            # deterministic init (PyTorch-style uniform bound 1/sqrt(fan_in))
            kw, kb = jax.random.split(k)
            bound = 1.0 / np.sqrt(fan_in)
            W = jax.random.uniform(kw, (fan_in, fan_out), jnp.float32,
                                   -bound, bound)
            bvec = jax.random.uniform(kb, (1, fan_out), jnp.float32,
                                      -bound, bound)
            return W, bvec

        def init_net(k, dims):
            keys = jax.random.split(k, len(dims) - 1)
            return tuple(init_linear(kk, dims[i], dims[i + 1])
                         for i, kk in enumerate(keys))

        kz, ks = jax.random.split(key)
        # unfused per-net parameters (kept for the pure-JAX reference)
        self.params_z = init_net(kz, (din_z, w, w, w, dim_z))
        self.params_s = init_net(ks, (din_s, w, w, w, dim_s))

        # ---- pack both sub-nets into one block-diagonal fused MLP ----------
        (w1z, b1z), (w2z, b2z), (w3z, b3z), (w4z, b4z) = self.params_z
        (w1s, b1s), (w2s, b2s), (w3s, b3s), (w4s, b4s) = self.params_s
        dz, ds, db = dim_z, dim_s, dim_b
        dzs = dz + ds
        f32, bf16 = jnp.float32, jnp.bfloat16

        def block_diag(a, b):
            top = jnp.concatenate(
                [a, jnp.zeros((a.shape[0], b.shape[1]), a.dtype)], axis=1)
            bot = jnp.concatenate(
                [jnp.zeros((b.shape[0], a.shape[1]), b.dtype), b], axis=1)
            return jnp.concatenate([top, bot], axis=0)

        if self.flag:
            w1z_b, w1z_x, w1z_t = w1z[:db], w1z[db:db + dz], w1z[db + dz:]
            w1s_b, w1s_x, w1s_t = w1s[:db], w1s[db:db + dzs], w1s[db + dzs:]
            W1b = jnp.concatenate([w1z_b, w1s_b], axis=1)          # [db, 2w]
        else:
            w1z_x, w1z_t = w1z[:dz], w1z[dz:]
            w1s_x, w1s_t = w1s[:dzs], w1s[dzs:]
            W1b = None

        # net_z only sees x[:, :dim_z]; its x_s rows are identically zero.
        W1x = jnp.concatenate(
            [jnp.concatenate([w1z_x, jnp.zeros((ds, w), f32)], axis=0),
             w1s_x], axis=1)                                       # [dzs, 2w]
        W1t = jnp.concatenate([w1z_t, w1s_t], axis=1)              # [1, 2w]
        B1 = jnp.concatenate([b1z, b1s], axis=1)                   # [1, 2w]
        # Fold SELU's output scale into the next layer's weights (exact).
        W2 = block_diag(w2z, w2s) * _SELU_SCALE                    # [2w, 2w]
        B2 = jnp.concatenate([b2z, b2s], axis=1)
        W3 = block_diag(w3z, w3s) * _SELU_SCALE
        B3 = jnp.concatenate([b3z, b3s], axis=1)
        W4 = block_diag(w4z, w4s) * _SELU_SCALE                    # [2w, dzs]
        B4 = jnp.concatenate([b4z, b4s], axis=1)                   # [1, dzs]

        # bf16 matmul operands; f32 biases / rank-1 t weights.
        W1x, W2, W3, W4 = (a.astype(bf16) for a in (W1x, W2, W3, W4))
        if self.flag:
            W1b = W1b.astype(bf16)
            self.packed = (W1b, W1x, W1t, B1, W2, B2, W3, B3, W4, B4)
        else:
            self.packed = (W1x, W1t, B1, W2, B2, W3, B3, W4, B4)

    def __call__(self, t, x, ten_BatchEmb):
        """
        t:            [b]                (float32)
        x:            [b, dim_z+dim_s]   (float32)
        ten_BatchEmb: [b, dim_b]         (float32)
        returns:      [b, dim_z+dim_s]  = cat([net_z(.), net_s(.)], dim=1)
        """
        assert t.ndim == 1 and x.ndim == 2 and ten_BatchEmb.ndim == 2
        assert x.shape[1] == self.dim_z + self.dim_s
        assert ten_BatchEmb.shape[1] == self.dim_b
        return _run_fused(t, x, ten_BatchEmb, self.packed, self.flag,
                          self.batch_tile)

    def forward_4torchdiffeq(self, t, x, ten_BatchEmb):
        """torchdiffeq-compatible entry: t is a 0-D scalar."""
        assert jnp.ndim(t) == 0
        b = x.shape[0]
        return self(jnp.full((b,), t, jnp.float32), x, ten_BatchEmb)


# ---------------------------------------------------------------------------
# Pure-JAX reference (unfused f32, matches the PyTorch module exactly)
# ---------------------------------------------------------------------------
def _reference_forward(model, t, x, ten_BatchEmb):
    def mlp(inp, params):
        h = inp
        for i, (W, b) in enumerate(params):
            h = h @ W + b
            if i < len(params) - 1:
                h = _SELU_SCALE * jnp.where(h > 0, h,
                                            _SELU_ALPHA * (jnp.exp(h) - 1.0))
        return h

    t_col = t[:, None]
    if model.flag:
        inp_z = jnp.concatenate([ten_BatchEmb, x[:, :model.dim_z], t_col], 1)
        inp_s = jnp.concatenate([ten_BatchEmb, x, t_col], 1)
    else:
        inp_z = jnp.concatenate([x[:, :model.dim_z], t_col], 1)
        inp_s = jnp.concatenate([x, t_col], 1)
    return jnp.concatenate([mlp(inp_z, model.params_z),
                            mlp(inp_s, model.params_s)], 1)


if __name__ == "__main__":
    # bf16 matmuls => loosened parity tolerance vs the pure-f32 reference.
    RTOL, ATOL = 5e-2, 5e-2

    # --- check 1: flag=True, tiny batch (single grid step) ------------------
    batch = 8
    dim_b, dim_z, dim_s, hidden = 4, 8, 8, 32

    key = jax.random.PRNGKey(0)
    k_t, k_x, k_e, k_p, k_p2 = jax.random.split(key, 5)

    t = jax.random.uniform(k_t, (batch,), jnp.float32)
    x = jax.random.normal(k_x, (batch, dim_z + dim_s), jnp.float32)
    ten_BatchEmb = jax.random.normal(k_e, (batch, dim_b), jnp.float32)

    model = MLPPallas(dim_b=dim_b, dim_z=dim_z, dim_s=dim_s,
                      flag_enable_batchtoken_flowmodule=True,
                      w=hidden, key=k_p)

    out = jax.block_until_ready(model(t, x, ten_BatchEmb))
    ref = jax.block_until_ready(_reference_forward(model, t, x, ten_BatchEmb))
    assert out.shape == (batch, dim_z + dim_s)
    np.testing.assert_allclose(np.asarray(out), np.asarray(ref),
                               rtol=RTOL, atol=ATOL)

    # --- check 2: flag=False, two grid steps with a ragged last block -------
    batch2 = 200   # TB = round_up(100, 8) = 104 -> grid = 2, last block ragged
    t2 = jax.random.uniform(jax.random.fold_in(k_t, 1), (batch2,), jnp.float32)
    x2 = jax.random.normal(jax.random.fold_in(k_x, 1),
                           (batch2, dim_z + dim_s), jnp.float32)
    be2 = jax.random.normal(jax.random.fold_in(k_e, 1),
                            (batch2, dim_b), jnp.float32)

    model2 = MLPPallas(dim_b=dim_b, dim_z=dim_z, dim_s=dim_s,
                       flag_enable_batchtoken_flowmodule=False,
                       w=hidden, key=k_p2)

    out2 = jax.block_until_ready(model2(t2, x2, be2))
    ref2 = jax.block_until_ready(_reference_forward(model2, t2, x2, be2))
    assert out2.shape == (batch2, dim_z + dim_s)
    assert bool(np.isfinite(np.asarray(out2)).all())
    np.testing.assert_allclose(np.asarray(out2), np.asarray(ref2),
                               rtol=RTOL, atol=ATOL)

    # --- check 3: flag=True, non-multiple-of-8 batch + user batch_tile ------
    batch3 = 37
    t3 = jax.random.uniform(jax.random.fold_in(k_t, 2), (batch3,), jnp.float32)
    x3 = jax.random.normal(jax.random.fold_in(k_x, 2),
                           (batch3, dim_z + dim_s), jnp.float32)
    be3 = jax.random.normal(jax.random.fold_in(k_e, 2),
                            (batch3, dim_b), jnp.float32)

    model3 = MLPPallas(dim_b=dim_b, dim_z=dim_z, dim_s=dim_s,
                       flag_enable_batchtoken_flowmodule=True,
                       w=hidden, key=k_p, batch_tile=12)   # rounded up to 16
    out3 = jax.block_until_ready(model3(t3, x3, be3))
    ref3 = jax.block_until_ready(_reference_forward(model3, t3, x3, be3))
    np.testing.assert_allclose(np.asarray(out3), np.asarray(ref3),
                               rtol=RTOL, atol=ATOL)

    print("KERNEL_OK")
</pallas_src>

<mosaic_0001>
module attributes {stable_mosaic.version = 11 : i64} {
  func.func @_fused_kernel_be(%arg0: i32, %arg1: memref<8x4xf32, #tpu.memory_space<vmem>>, %arg2: memref<8x16xf32, #tpu.memory_space<vmem>>, %arg3: memref<8x1xf32, #tpu.memory_space<vmem>>, %arg4: memref<4x64xbf16, #tpu.memory_space<vmem>>, %arg5: memref<16x64xbf16, #tpu.memory_space<vmem>>, %arg6: memref<1x64xf32, #tpu.memory_space<vmem>>, %arg7: memref<1x64xf32, #tpu.memory_space<vmem>>, %arg8: memref<64x64xbf16, #tpu.memory_space<vmem>>, %arg9: memref<1x64xf32, #tpu.memory_space<vmem>>, %arg10: memref<64x64xbf16, #tpu.memory_space<vmem>>, %arg11: memref<1x64xf32, #tpu.memory_space<vmem>>, %arg12: memref<64x16xbf16, #tpu.memory_space<vmem>>, %arg13: memref<1x16xf32, #tpu.memory_space<vmem>>, %arg14: memref<8x16xf32, #tpu.memory_space<vmem>>) attributes {dimension_semantics = [#tpu.dimension_semantics<parallel>], iteration_bounds = array<i64: 1>, scalar_prefetch = 0 : i64, scratch_operands = 0 : i64, tpu.core_type = #tpu.core_type<tc>, window_params = [{transform_indices = @transform_0, window_bounds = array<i64: 8, 4>}, {transform_indices = @transform_1, window_bounds = array<i64: 8, 16>}, {transform_indices = @transform_2, window_bounds = array<i64: 8, 1>}, {pipeline_mode = #tpu.pipeline_mode<synchronous>, transform_indices = @transform_3, window_bounds = array<i64: 4, 64>}, {pipeline_mode = #tpu.pipeline_mode<synchronous>, transform_indices = @transform_4, window_bounds = array<i64: 16, 64>}, {pipeline_mode = #tpu.pipeline_mode<synchronous>, transform_indices = @transform_5, window_bounds = array<i64: 1, 64>}, {pipeline_mode = #tpu.pipeline_mode<synchronous>, transform_indices = @transform_6, window_bounds = array<i64: 1, 64>}, {pipeline_mode = #tpu.pipeline_mode<synchronous>, transform_indices = @transform_7, window_bounds = array<i64: 64, 64>}, {pipeline_mode = #tpu.pipeline_mode<synchronous>, transform_indices = @transform_8, window_bounds = array<i64: 1, 64>}, {pipeline_mode = #tpu.pipeline_mode<synchronous>, transform_indices = @transform_9, window_bounds = array<i64: 64, 64>}, {pipeline_mode = #tpu.pipeline_mode<synchronous>, transform_indices = @transform_10, window_bounds = array<i64: 1, 64>}, {pipeline_mode = #tpu.pipeline_mode<synchronous>, transform_indices = @transform_11, window_bounds = array<i64: 64, 16>}, {pipeline_mode = #tpu.pipeline_mode<synchronous>, transform_indices = @transform_12, window_bounds = array<i64: 1, 16>}, {transform_indices = @transform_13, window_bounds = array<i64: 8, 16>}]} {
    %c0 = arith.constant 0 : index
    %c0_0 = arith.constant 0 : index
    %0 = vector.load %arg2[%c0, %c0_0] : memref<8x16xf32, #tpu.memory_space<vmem>>, vector<8x16xf32>
    %1 = arith.truncf %0 : vector<8x16xf32> to vector<8x16xbf16>
    %c0_1 = arith.constant 0 : index
    %c0_2 = arith.constant 0 : index
    %2 = vector.load %arg5[%c0_1, %c0_2] : memref<16x64xbf16, #tpu.memory_space<vmem>>, vector<16x64xbf16>
    %cst = arith.constant dense<0.000000e+00> : vector<8x64xf32>
    %3 = tpu.matmul %1, %2, %cst {dimension_numbers = #tpu.dot_dimension_numbers<[1], [0], [0], [1], [0, 0, 1, 1], [], []>} : vector<8x16xbf16>, vector<16x64xbf16>, vector<8x64xf32> -> vector<8x64xf32>
    %c0_3 = arith.constant 0 : index
    %c0_4 = arith.constant 0 : index
    %4 = vector.load %arg1[%c0_3, %c0_4] : memref<8x4xf32, #tpu.memory_space<vmem>>, vector<8x4xf32>
    %5 = arith.truncf %4 : vector<8x4xf32> to vector<8x4xbf16>
    %c0_5 = arith.constant 0 : index
    %c0_6 = arith.constant 0 : index
    %6 = vector.load %arg4[%c0_5, %c0_6] : memref<4x64xbf16, #tpu.memory_space<vmem>>, vector<4x64xbf16>
    %cst_7 = arith.constant dense<0.000000e+00> : vector<8x64xf32>
    %7 = tpu.matmul %5, %6, %cst_7 {dimension_numbers = #tpu.dot_dimension_numbers<[1], [0], [0], [1], [0, 0, 1, 1], [], []>} : vector<8x4xbf16>, vector<4x64xbf16>, vector<8x64xf32> -> vector<8x64xf32>
    %8 = arith.addf %3, %7 : vector<8x64xf32>
    %c0_8 = arith.constant 0 : index
    %c0_9 = arith.constant 0 : index
    %9 = vector.load %arg3[%c0_8, %c0_9] : memref<8x1xf32, #tpu.memory_space<vmem>>, vector<8x1xf32>
    %c0_10 = arith.constant 0 : index
    %c0_11 = arith.constant 0 : index
    %10 = vector.load %arg6[%c0_10, %c0_11] : memref<1x64xf32, #tpu.memory_space<vmem>>, vector<1x64xf32>
    %11 = vector.broadcast %9 : vector<8x1xf32> to vector<8x64xf32>
    %12 = vector.broadcast %10 : vector<1x64xf32> to vector<8x64xf32>
    %13 = arith.mulf %11, %12 : vector<8x64xf32>
    %14 = arith.addf %8, %13 : vector<8x64xf32>
    %c0_12 = arith.constant 0 : index
    %c0_13 = arith.constant 0 : index
    %15 = vector.load %arg7[%c0_12, %c0_13] : memref<1x64xf32, #tpu.memory_space<vmem>>, vector<1x64xf32>
    %16 = vector.broadcast %15 : vector<1x64xf32> to vector<8x64xf32>
    %17 = arith.addf %14, %16 : vector<8x64xf32>
    %cst_14 = arith.constant 0.000000e+00 : f32
    %18 = vector.broadcast %cst_14 : f32 to vector<8x64xf32>
    %19 = arith.cmpf ogt, %17, %18 : vector<8x64xf32>
    %20 = math.exp %17 : vector<8x64xf32>
    %cst_15 = arith.constant 1.000000e+00 : f32
    %21 = vector.broadcast %cst_15 : f32 to vector<8x64xf32>
    %22 = arith.subf %20, %21 : vector<8x64xf32>
    %cst_16 = arith.constant 1.67326319 : f32
    %23 = vector.broadcast %cst_16 : f32 to vector<8x64xf32>
    %24 = arith.mulf %23, %22 : vector<8x64xf32>
    %25 = arith.select %19, %17, %24 : vector<8x64xi1>, vector<8x64xf32>
    %26 = arith.truncf %25 : vector<8x64xf32> to vector<8x64xbf16>
    %c0_17 = arith.constant 0 : index
    %c0_18 = arith.constant 0 : index
    %27 = vector.load %arg8[%c0_17, %c0_18] : memref<64x64xbf16, #tpu.memory_space<vmem>>, vector<64x64xbf16>
    %cst_19 = arith.constant dense<0.000000e+00> : vector<8x64xf32>
    %28 = tpu.matmul %26, %27, %cst_19 {dimension_numbers = #tpu.dot_dimension_numbers<[1], [0], [0], [1], [0, 0, 1, 1], [], []>} : vector<8x64xbf16>, vector<64x64xbf16>, vector<8x64xf32> -> vector<8x64xf32>
    %c0_20 = arith.constant 0 : index
    %c0_21 = arith.constant 0 : index
    %29 = vector.load %arg9[%c0_20, %c0_21] : memref<1x64xf32, #tpu.memory_space<vmem>>, vector<1x64xf32>
    %30 = vector.broadcast %29 : vector<1x64xf32> to vector<8x64xf32>
    %31 = arith.addf %28, %30 : vector<8x64xf32>
    %cst_22 = arith.constant 0.000000e+00 : f32
    %32 = vector.broadcast %cst_22 : f32 to vector<8x64xf32>
    %33 = arith.cmpf ogt, %31, %32 : vector<8x64xf32>
    %34 = math.exp %31 : vector<8x64xf32>
    %cst_23 = arith.constant 1.000000e+00 : f32
    %35 = vector.broadcast %cst_23 : f32 to vector<8x64xf32>
    %36 = arith.subf %34, %35 : vector<8x64xf32>
    %cst_24 = arith.constant 1.67326319 : f32
    %37 = vector.broadcast %cst_24 : f32 to vector<8x64xf32>
    %38 = arith.mulf %37, %36 : vector<8x64xf32>
    %39 = arith.select %33, %31, %38 : vector<8x64xi1>, vector<8x64xf32>
    %40 = arith.truncf %39 : vector<8x64xf32> to vector<8x64xbf16>
    %c0_25 = arith.constant 0 : index
    %c0_26 = arith.constant 0 : index
    %41 = vector.load %arg10[%c0_25, %c0_26] : memref<64x64xbf16, #tpu.memory_space<vmem>>, vector<64x64xbf16>
    %cst_27 = arith.constant dense<0.000000e+00> : vector<8x64xf32>
    %42 = tpu.matmul %40, %41, %cst_27 {dimension_numbers = #tpu.dot_dimension_numbers<[1], [0], [0], [1], [0, 0, 1, 1], [], []>} : vector<8x64xbf16>, vector<64x64xbf16>, vector<8x64xf32> -> vector<8x64xf32>
    %c0_28 = arith.constant 0 : index
    %c0_29 = arith.constant 0 : index
    %43 = vector.load %arg11[%c0_28, %c0_29] : memref<1x64xf32, #tpu.memory_space<vmem>>, vector<1x64xf32>
    %44 = vector.broadcast %43 : vector<1x64xf32> to vector<8x64xf32>
    %45 = arith.addf %42, %44 : vector<8x64xf32>
    %cst_30 = arith.constant 0.000000e+00 : f32
    %46 = vector.broadcast %cst_30 : f32 to vector<8x64xf32>
    %47 = arith.cmpf ogt, %45, %46 : vector<8x64xf32>
    %48 = math.exp %45 : vector<8x64xf32>
    %cst_31 = arith.constant 1.000000e+00 : f32
    %49 = vector.broadcast %cst_31 : f32 to vector<8x64xf32>
    %50 = arith.subf %48, %49 : vector<8x64xf32>
    %cst_32 = arith.constant 1.67326319 : f32
    %51 = vector.broadcast %cst_32 : f32 to vector<8x64xf32>
    %52 = arith.mulf %51, %50 : vector<8x64xf32>
    %53 = arith.select %47, %45, %52 : vector<8x64xi1>, vector<8x64xf32>
    %54 = arith.truncf %53 : vector<8x64xf32> to vector<8x64xbf16>
    %c0_33 = arith.constant 0 : index
    %c0_34 = arith.constant 0 : index
    %55 = vector.load %arg12[%c0_33, %c0_34] : memref<64x16xbf16, #tpu.memory_space<vmem>>, vector<64x16xbf16>
    %cst_35 = arith.constant dense<0.000000e+00> : vector<8x16xf32>
    %56 = tpu.matmul %54, %55, %cst_35 {dimension_numbers = #tpu.dot_dimension_numbers<[1], [0], [0], [1], [0, 0, 1, 1], [], []>} : vector<8x64xbf16>, vector<64x16xbf16>, vector<8x16xf32> -> vector<8x16xf32>
    %c0_36 = arith.constant 0 : index
    %c0_37 = arith.constant 0 : index
    %57 = vector.load %arg13[%c0_36, %c0_37] : memref<1x16xf32, #tpu.memory_space<vmem>>, vector<1x16xf32>
    %58 = vector.broadcast %57 : vector<1x16xf32> to vector<8x16xf32>
    %59 = arith.addf %56, %58 : vector<8x16xf32>
    %c0_38 = arith.constant 0 : index
    %c0_39 = arith.constant 0 : index
    %60 = vector.load %arg14[%c0_38, %c0_39] : memref<8x16xf32, #tpu.memory_space<vmem>>, vector<8x16xf32>
    tpu.vector_store %arg14[%c0_38, %c0_39], %59 {strides = array<i32>} : memref<8x16xf32, #tpu.memory_space<vmem>>, vector<8x16xf32>,
    return
  }
  func.func @transform_0(%arg0: i32) -> (i32, i32) {
    %c0_i32 = arith.constant 0 : i32
    %c0_i32_0 = arith.constant 0 : i32
    return %arg0, %c0_i32 : i32, i32
  }
  func.func @transform_1(%arg0: i32) -> (i32, i32) {
    %c0_i32 = arith.constant 0 : i32
    %c0_i32_0 = arith.constant 0 : i32
    return %arg0, %c0_i32 : i32, i32
  }
  func.func @transform_2(%arg0: i32) -> (i32, i32) {
    %c0_i32 = arith.constant 0 : i32
    %c0_i32_0 = arith.constant 0 : i32
    return %arg0, %c0_i32 : i32, i32
  }
  func.func @transform_3(%arg0: i32) -> (i32, i32) {
    %c0_i32 = arith.constant 0 : i32
    %c0_i32_0 = arith.constant 0 : i32
    %c0_i32_1 = arith.constant 0 : i32
    return %c0_i32, %c0_i32_0 : i32, i32
  }
  func.func @transform_4(%arg0: i32) -> (i32, i32) {
    %c0_i32 = arith.constant 0 : i32
    %c0_i32_0 = arith.constant 0 : i32
    %c0_i32_1 = arith.constant 0 : i32
    return %c0_i32, %c0_i32_0 : i32, i32
  }
  func.func @transform_5(%arg0: i32) -> (i32, i32) {
    %c0_i32 = arith.constant 0 : i32
    %c0_i32_0 = arith.constant 0 : i32
    %c0_i32_1 = arith.constant 0 : i32
    return %c0_i32, %c0_i32_0 : i32, i32
  }
  func.func @transform_6(%arg0: i32) -> (i32, i32) {
    %c0_i32 = arith.constant 0 : i32
    %c0_i32_0 = arith.constant 0 : i32
    %c0_i32_1 = arith.constant 0 : i32
    return %c0_i32, %c0_i32_0 : i32, i32
  }
  func.func @transform_7(%arg0: i32) -> (i32, i32) {
    %c0_i32 = arith.constant 0 : i32
    %c0_i32_0 = arith.constant 0 : i32
    %c0_i32_1 = arith.constant 0 : i32
    return %c0_i32, %c0_i32_0 : i32, i32
  }
  func.func @transform_8(%arg0: i32) -> (i32, i32) {
    %c0_i32 = arith.constant 0 : i32
    %c0_i32_0 = arith.constant 0 : i32
    %c0_i32_1 = arith.constant 0 : i32
    return %c0_i32, %c0_i32_0 : i32, i32
  }
  func.func @transform_9(%arg0: i32) -> (i32, i32) {
    %c0_i32 = arith.constant 0 : i32
    %c0_i32_0 = arith.constant 0 : i32
    %c0_i32_1 = arith.constant 0 : i32
    return %c0_i32, %c0_i32_0 : i32, i32
  }
  func.func @transform_10(%arg0: i32) -> (i32, i32) {
    %c0_i32 = arith.constant 0 : i32
    %c0_i32_0 = arith.constant 0 : i32
    %c0_i32_1 = arith.constant 0 : i32
    return %c0_i32, %c0_i32_0 : i32, i32
  }
  func.func @transform_11(%arg0: i32) -> (i32, i32) {
    %c0_i32 = arith.constant 0 : i32
    %c0_i32_0 = arith.constant 0 : i32
    %c0_i32_1 = arith.constant 0 : i32
    return %c0_i32, %c0_i32_0 : i32, i32
  }
  func.func @transform_12(%arg0: i32) -> (i32, i32) {
    %c0_i32 = arith.constant 0 : i32
    %c0_i32_0 = arith.constant 0 : i32
    %c0_i32_1 = arith.constant 0 : i32
    return %c0_i32, %c0_i32_0 : i32, i32
  }
  func.func @transform_13(%arg0: i32) -> (i32, i32) {
    %c0_i32 = arith.constant 0 : i32
    %c0_i32_0 = arith.constant 0 : i32
    return %arg0, %c0_i32 : i32, i32
  }
}

</mosaic_0001>

<bundles_post_ra>
// kernel: tpu_custom_call.1
= control target key start
LH: loop header
LB: loop body
LE: loop exit
PB: predicated region body
PF: predicated region fallthrough
CT: control target
= control target key end

     0   :  { %18 = vsyncpa [#allocation3], 0  ;;  %s699_s0 = inlined_call_operand.vmem [shape: f32[8,4], index: 0, kind: input, shape index: {}]   ;;  %s700_s1 = inlined_call_operand.hbm [shape: f32[8,16], index: 1, kind: input, shape index: {}]   ;;  %s701_s2 = inlined_call_operand.vmem [shape: f32[8,1], index: 2, kind: input, shape index: {}]   ;;  %s702_s3 = inlined_call_operand.hbm [shape: bf16[4,64], index: 3, kind: input, shape index: {}]   ;;  %s703_s4 = inlined_call_operand.hbm [shape: bf16[16,64], index: 4, kind: input, shape index: {}]   ;;  %s704_s5 = inlined_call_operand.vmem [shape: f32[1,64], index: 5, kind: input, shape index: {}]   ;;  %s705_s6 = inlined_call_operand.vmem [shape: f32[1,64], index: 6, kind: input, shape index: {}]   ;;  %s706_s7 = inlined_call_operand.vmem [shape: bf16[64,64], index: 7, kind: input, shape index: {}]   ;;  %s707_s8 = inlined_call_operand.vmem [shape: f32[1,64], index: 8, kind: input, shape index: {}]   ;;  %s708_s9 = inlined_call_operand.vmem [shape: bf16[64,64], index: 9, kind: input, shape index: {}]   ;;  %s709_s10 = inlined_call_operand.vmem [shape: f32[1,64], index: 10, kind: input, shape index: {}]   ;;  %s710_s11 = inlined_call_operand.vmem [shape: bf16[64,16], index: 11, kind: input, shape index: {}]   ;;  %s711_s12 = inlined_call_operand.vmem [shape: f32[1,16], index: 12, kind: input, shape index: {}]   ;;  %s712_s13 = inlined_call_operand.hbm [shape: f32[8,16], index: 13, kind: output, shape index: {}]  }
   0x1   :  { %19 = vsyncpa [#allocation6], 0  ;;  %s41_s27 = sshll.u32 %s702_s3, 4  ;;  %s42_s27 = int_to_ptr.hbm [resolvable:$true] %s41_s27 }
   0x2   :  { %20 = vsyncpa [#allocation4], 0  ;;  %s548_s28 = smov [#allocation5]   ;;  %s28_s15 = sshll.u32 %s700_s1, 4  ;;  %s29_s15 = int_to_ptr.hbm [resolvable:$true] %s28_s15 }
   0x3   :  { %s43_s29 = sshll.u32 %s548_s28, 4  ;;  %s549_s16 = smov [#allocation2]   ;;  %s44_s29 = int_to_ptr.vmem [resolvable:$true] %s43_s29 }
   0x4   :  { %46 = dma.hbm_to_vmem [thread:$0]  %s42_s27, 32, %s44_s29, [#allocation6]  }
   0x5   :  { %s30_s17 = sshll.u32 %s549_s16, 4  ;;  %s51_s20 = sshll.u32 %s703_s4, 4  ;;  %s31_s17 = int_to_ptr.vmem [resolvable:$true] %s30_s17  ;;  %s52_s20 = int_to_ptr.hbm [resolvable:$true] %s51_s20 }
   0x6   :  { %33 = dma.hbm_to_vmem [thread:$0]  %s29_s15, 128, %s31_s17, [#allocation3]  }
   0x7   :  { %s550_s3 = smov [#allocation7]   ;;  %s551_s22 = smov 64  }
   0x8   :  { %s53_s21 = sshll.u32 %s550_s3, 4  ;;  %s552_s23 = smov 4   ;;  %s54_s21 = int_to_ptr.vmem [resolvable:$true] %s53_s21 }
   0x9   :  { %59 = dma.hbm_to_vmem [thread:$0]  %s52_s20, 128, %s54_s21, [#allocation6], %s551_s22, %s551_s22, %s552_s23  }
   0xa   :  { %542 = dma.done.wait [#allocation3], 128  }
   0xb   :  { %543 = vsyncadd [#allocation3], 4294967168 }
   0xc   :  { %544 = dma.done.wait [#allocation6], 160  }
   0xd   :  { %545 = vsyncadd [#allocation6], 4294967136  ;;  %v553_v0 = vmov 0   ;;  %vm100_vm0 = vcmask 1041408   ;;  %v95_v1 = vld [vmem:[#allocation5] sm:$0x3] }
   0xe   :  { %434 = vset.pattern.permute.xlu0 %v553_v0  ;;  %v414_v2 = vld [vmem:[#allocation7] sm:$0xff]  ;;  %v93_v3 = vld [vmem:[%s699_s0] sm:$0xff]  ;;  %vm96_vm1 = vcmask 31744   ;;  %v102_v4 = vsel %vm100_vm0, %v95_v1, 0  ;;  %vm123_vm2 = vcmask 130048   ;;  %v418_v9 = vld [vmem:[%s706_s7 + $0x18] sm:$0xff] }
   0xf   :  { %v94_v5 = vpack.c.bf16 %v93_v3, %v93_v3  ;;  %v89_v6 = vld [vmem:[#allocation2] sm:$0xff]  ;;  %111 = vmatpush.bf16.msra.mxu0 %v102_v4  ;;  %134 = vmatpush.bf16.msra.mxu1 %v414_v2  ;;  %v417_v10 = vld [vmem:[%s706_s7 + $0x10] sm:$0xff]  ;;  %v416_v11 = vld [vmem:[%s706_s7 + $0x8] sm:$0xff]  ;;  %vm200_vm4 = vcmask 523264   ;;  %s343_s16 = sshll.u32 %s712_s13, 4  ;;  %s344_s16 = int_to_ptr.hbm [resolvable:$true] %s343_s16 }
  0x10   :  { %v140_v7 = vld [vmem:[%s701_s2] sm:$0xff]  ;;  %v90_v8 = vpack.c.bf16 %v89_v6, %v89_v6  ;;  %208 = vmatpush.bf16.msra.mxu2 %v418_v9  ;;  %v422_v30 = vld [vmem:[%s708_s9 + $0x18] sm:$0xff]  ;;  %v421_v31 = vld [vmem:[%s708_s9 + $0x10] sm:$0xff]  ;;  %s554_s2 = smov [#allocation8]  }
  0x11   :  { %144 = vperm.xlu0 %434, %v140_v7   ;;  %v415_v12 = vld [vmem:[%s706_s7] sm:$0xff]  ;;  %267 = vmatpush.bf16.msra.mxu3 %v422_v30  ;;  %v420_v32 = vld [vmem:[%s708_s9 + $0x8] sm:$0xff]  ;;  %v426_v44 = vld [vmem:[%s710_s11 + $0x18] sm:$0xff]  ;;  %s341_s14 = sshll.u32 %s554_s2, 4  ;;  %s342_s14 = int_to_ptr.vmem [resolvable:$true] %s341_s14 }
  0x12   :  { %354 = vmatmul.msk.bf16.vlgmr.msra.gmra.mxu0 %vm96_vm1, %v94_v5  ;;  %359 = vmatmul.msk.bf16.vlgmr.msra.gmra.mxu1 %vm123_vm2, %v90_v8  ;;  %v435_v13 = vld [vmem:[%s704_s5] ss:$0 sm:$0xff]  ;;  %v425_v45 = vld [vmem:[%s710_s11 + $0x10] sm:$0xff]  ;;  %v424_v46 = vld [vmem:[%s710_s11 + $0x8] sm:$0xff] }
  0x13   :  { %v436_v19 = vld [vmem:[%s705_s6] ss:$0 sm:$0xff]  ;;  %326 = vmatpush.bf16.msrb.mxu0 %v426_v44 }
  0x14   :  { %209 = vmatpush.bf16.msra.mxu2 %v417_v10  ;;  %v419_v33 = vld [vmem:[%s708_s9] sm:$0xff] }
  0x15   :  { %268 = vmatpush.bf16.msra.mxu3 %v421_v31  ;;  %v437_v34 = vld [vmem:[%s707_s8] ss:$0 sm:$0xff] }
  0x16   :  { %v423_v47 = vld [vmem:[%s710_s11] sm:$0xff] }
  0x17   :  { %327 = vmatpush.bf16.msrb.mxu0 %v425_v45  ;;  %v438_v48 = vld [vmem:[%s709_s10] ss:$0 sm:$0xff] }
  0x18   :  { %210 = vmatpush.bf16.msra.mxu2 %v416_v11  ;;  %v439_v58 = vld [vmem:[%s711_s12] ss:$0 sm:$0xff] }
  0x19   :  { %269 = vmatpush.bf16.msra.mxu3 %v420_v32 }
  0x1b   :  { %328 = vmatpush.bf16.msrb.mxu0 %v424_v46 }
  0x1c   :  { %211 = vmatpush.bf16.msra.mxu2 %v415_v12 }
  0x1d   :  { %270 = vmatpush.bf16.msra.mxu3 %v419_v33 }
  0x1f   :  { %329 = vmatpush.bf16.msrb.mxu0 %v423_v47 }
  0x83   :  { %v145_v14 = vpop.permute.xlu0 %144 }
  0x84   :  { %v150_v15 = vmul.f32 %v435_v13, %v145_v14 }
  0x8f   :  { %v113_v16 = vpop.f32.mrf.mxu0  ;;  %v136_v17 = vpop.f32.mrf.mxu1 }
  0x90   :  { %v137_v18 = vadd.f32 %v136_v17, %v113_v16 }
  0x92   :  { %v151_v20 = vadd.f32 %v150_v15, %v137_v18 }
  0x94   :  { %v156_v21 = vadd.f32 %v436_v19, %v151_v20 }
  0x96   :  { %v158_v22 = vmul.f32 1.442695, %v156_v21  ;;  %vm157_vm3 = vcmp.gt.f32.partialorder %v156_v21, 0.0 }
  0x97   :  { %v115_v23 = vpop.f32.mrf.mxu0  ;;  %v138_v24 = vpop.f32.mrf.mxu1 }
  0x98   :  { %440 = vpow2.f32 %v158_v22 }
  0x9e   :  { %v441_v25 = vpop.eup %440 }
  0x9f   :  { %v360_v26 = vadd.f32 -1.0, %v441_v25 }
  0xa1   :  { %v161_v27 = vmul.f32 1.6732632, %v360_v26 }
  0xa3   :  { %v162_v28 = vsel %vm157_vm3, %v156_v21, %v161_v27 }
  0xa4   :  { %v163_v29 = vpack.c.bf16 %v162_v28, %v162_v28 }
  0xa6   :  { %377 = vmatmul.msk.bf16.vlgmr.msra.gmra.mxu2 %vm200_vm4, %v163_v29 }
 0x129   :  { %v213_v35 = vpop.f32.mrf.mxu2 }
 0x12a   :  { %v214_v36 = vadd.f32 %v437_v34, %v213_v35 }
 0x12c   :  { %v218_v37 = vmul.f32 1.442695, %v214_v36  ;;  %vm217_vm5 = vcmp.gt.f32.partialorder %v214_v36, 0.0 }
 0x12e   :  { %442 = vpow2.f32 %v218_v37 }
 0x131   :  { %v215_v38 = vpop.f32.mrf.mxu2 }
 0x134   :  { %v443_v39 = vpop.eup %442 }
 0x135   :  { %v378_v40 = vadd.f32 -1.0, %v443_v39 }
 0x137   :  { %v221_v41 = vmul.f32 1.6732632, %v378_v40 }
 0x139   :  { %v222_v42 = vsel %vm217_vm5, %v214_v36, %v221_v41 }
 0x13a   :  { %v223_v43 = vpack.c.bf16 %v222_v42, %v222_v42 }
 0x13c   :  { %395 = vmatmul.msk.bf16.vlgmr.msra.gmra.mxu3 %vm200_vm4, %v223_v43 }
 0x1bf   :  { %v272_v49 = vpop.f32.mrf.mxu3 }
 0x1c0   :  { %v273_v50 = vadd.f32 %v438_v48, %v272_v49 }
 0x1c2   :  { %v277_v51 = vmul.f32 1.442695, %v273_v50  ;;  %vm276_vm6 = vcmp.gt.f32.partialorder %v273_v50, 0.0 }
 0x1c4   :  { %444 = vpow2.f32 %v277_v51 }
 0x1c7   :  { %v274_v52 = vpop.f32.mrf.mxu3 }
 0x1ca   :  { %v445_v53 = vpop.eup %444 }
 0x1cb   :  { %v396_v54 = vadd.f32 -1.0, %v445_v53 }
 0x1cd   :  { %v280_v55 = vmul.f32 1.6732632, %v396_v54 }
 0x1cf   :  { %v281_v56 = vsel %vm276_vm6, %v273_v50, %v280_v55 }
 0x1d0   :  { %v282_v57 = vpack.c.bf16 %v281_v56, %v281_v56 }
 0x1d2   :  { %413 = vmatmul.msk.bf16.vlgmr.msrb.gmra.mxu0 %vm200_vm4, %v282_v57 }
 0x24f   :  { %v331_v59 = vpop.f32.mrf.mxu0 }
 0x250   :  { %v332_v60 = vadd.f32 %v439_v58, %v331_v59 }
 0x252   :  { %335 = vst.msk [vmem:[#allocation8] sm:$0xff] %vm123_vm2, %v332_v60 }
 0x253   :  { %346 = dma.vmem_to_hbm [thread:$0]  %s342_s14, 128, %s344_s16, [#allocation4]  }
 0x257   :  { %v333_v61 = vpop.f32.mrf.mxu0 }
 0x258   :  { %546 = dma.done.wait [#allocation4], 128  }
 0x259   :  { %547 = vsyncadd [#allocation4], 4294967168 }
 0x25a   :  { %351 = vsyncpa [#allocation3], 1 }
 0x25b   :  { %352 = vsyncpa [#allocation6], 1 }
 0x25c   :  { %353 = vsyncpa [#allocation4], 1 }

</bundles_post_ra>
